<compile_context>
chip_gen: v5e
topology: v5e:2x2
jax: 0.10.0
libtpu: 0.0.40
codegen_flags: <defaults>
</compile_context>

<pallas_src>
import functools

import jax
import jax.numpy as jnp
from jax.experimental import pallas as pl
from jax.experimental.pallas import tpu as pltpu


def _round_up(n: int, m: int) -> int:
    return ((n + m - 1) // m) * m


def _cdiv(a: int, b: int) -> int:
    return -(-a // b)


# --------------------------------- kernel -----------------------------------

def actor_kernel(x_ref, p_ref, o_ref, *, F, S, A):
    """Fused 3-layer MLP: tanh(relu(relu(x@W0'+b0')@W1+b1)@W2+b2)[:, :A].

    p_ref packs, row-wise: W0' [0,F), W1 [F,2F), W2 [2F,3F), then an 8-row bias
    block (rows b0', b1, b2, zero padding); each weight slab is zero-padded to
    F = round_up(max_dim, 128) lanes.  Matmuls run at the params' storage dtype
    (bf16 by default) with f32 accumulation; all elementwise work (bias add,
    ReLU, tanh) stays in f32.  The state-norm is folded into W0'/b0' at pack
    time, so the kernel sees raw state.
    """
    mm_dtype = p_ref.dtype
    x = x_ref[...].astype(mm_dtype)                       # [tb, S]  (no lane pad)

    w0 = p_ref[0:S, :]                                    # [S, F]   folded norm
    w1 = p_ref[1 * F:2 * F, :]                            # [F, F]
    w2 = p_ref[2 * F:3 * F, :]                            # [F, F]
    b = p_ref[3 * F:3 * F + 8, :].astype(jnp.float32)     # [8, F]   bias block

    h = jnp.dot(x, w0, preferred_element_type=jnp.float32) + b[0:1, :]
    h = jnp.maximum(h, 0.0)
    h = jnp.dot(h.astype(mm_dtype), w1, preferred_element_type=jnp.float32) + b[1:2, :]
    h = jnp.maximum(h, 0.0)
    h = jnp.dot(h.astype(mm_dtype), w2, preferred_element_type=jnp.float32) + b[2:3, :]
    o_ref[...] = jnp.tanh(h[:, :A]).astype(o_ref.dtype)   # only A valid lanes stored


# ------------------------------ param packing -------------------------------
# Call ONCE (outside the forward path / training loop) and reuse the slab.

def pack_actor_params(params, dtype=jnp.bfloat16):
    """Fold state normalization into layer 0 and pack all weights/biases into a
    single (8,128)-aligned slab of shape [3F + 8, F]."""
    avg, std, w0, b0, w1, b1, w2, b2 = params
    S, H0 = w0.shape
    H1, A = w2.shape
    F = _round_up(max(S, H0, H1, A), 128)

    # Fold (x - avg) / std into the first linear layer (identical math; the
    # original module also has no epsilon on state_std -> std must be nonzero).
    avg = jnp.asarray(avg, jnp.float32).reshape(1, S)
    inv_std = 1.0 / jnp.asarray(std, jnp.float32).reshape(1, S)
    w0 = jnp.asarray(w0, jnp.float32)
    w0f = w0 * inv_std.reshape(S, 1)
    b0f = jnp.asarray(b0, jnp.float32).reshape(1, H0) - (avg * inv_std) @ w0

    def slab(w):  # zero-pad [in, out] -> [F, F]
        w = jnp.asarray(w, jnp.float32)
        return jnp.zeros((F, F), jnp.float32).at[:w.shape[0], :w.shape[1]].set(w)

    def brow(bvec):  # zero-pad bias -> [1, F]
        bvec = jnp.asarray(bvec, jnp.float32).reshape(1, -1)
        return jnp.zeros((1, F), jnp.float32).at[:, :bvec.shape[1]].set(bvec)

    bias_blk = jnp.concatenate(
        [brow(b0f), brow(b1), brow(b2), jnp.zeros((5, F), jnp.float32)], axis=0)
    packed = jnp.concatenate([slab(w0f), slab(w1), slab(w2), bias_blk], axis=0)
    # Fold & pack in f32; cast once at the end (bf16 rounding happens after the
    # 1/std scale — see correctness note about wide-dynamic-range std).
    return packed.astype(dtype)


# --------------------------------- wrapper ----------------------------------

def actor_forward(state, packed, *, action_dim, tile_b=2048):
    """state: [B, S].  packed: [3F+8, F] slab from pack_actor_params()."""
    B, S = state.shape
    rows, F = packed.shape
    assert rows == 3 * F + 8, "packed params slab has unexpected shape"
    A = action_dim

    # Batch tiling: 16-row alignment for bf16 params (native (16,128) tile),
    # 8 for f32.  Large tiles amortize the ~0.35 us per-grid-step overhead.
    align = 16 if packed.dtype == jnp.bfloat16 else 8
    Ba = _round_up(max(B, align), align)
    tb = max(align, min(tile_b, Ba))
    n_steps = _cdiv(Ba, tb)
    # v7x megacore: if the whole batch fits one tile but is big enough that
    # splitting does not just double the per-step overhead, use >= 2 grid steps
    # so both TensorCores get work (costs nothing on single-TC v5e/v6e).
    if n_steps == 1 and Ba >= 256:
        n_steps = 2
    tb = _round_up(_cdiv(Ba, n_steps), align)
    Bp = _round_up(Ba, tb)
    grid = (Bp // tb,)

    # Pad only the batch dim (last dim stays S -> tiny, contiguous pad pass;
    # padded rows flow through harmlessly and are sliced away below).
    x = state
    if Bp != B:
        x = jnp.zeros((Bp, S), state.dtype).at[:B, :].set(state)

    out = pl.pallas_call(
        functools.partial(actor_kernel, F=F, S=S, A=A),
        grid=grid,
        in_specs=[
            pl.BlockSpec((tb, S), lambda i: (i, 0)),       # batch tile, K = S (no lane pad)
            pl.BlockSpec((rows, F), lambda i: (0, 0)),     # all params, resident in VMEM
        ],
        out_specs=pl.BlockSpec((tb, A), lambda i: (i, 0)),  # narrow [tb, A] writeback
        out_shape=jax.ShapeDtypeStruct((Bp, A), jnp.float32),
        compiler_params=pltpu.CompilerParams(
            dimension_semantics=("parallel",),              # megacore-shardable on v7x
            vmem_limit_bytes=32 * 1024 * 1024,              # headroom vs v5e's 16 MiB default
        ),
    )(x, packed)
    if Bp != B:
        out = out[:B]
    return out


# ----------------------- deterministic parameter init -----------------------

def init_actor_params(key, state_dim, hidden_dims, action_dim):
    dims = [state_dim, *hidden_dims, action_dim]
    keys = jax.random.split(key, 2 * (len(dims) - 1))

    weights, biases = [], []
    for i in range(len(dims) - 1):
        fan_in, fan_out = dims[i], dims[i + 1]
        if i == len(dims) - 2:
            # layer_init_with_orthogonal(last_layer, std=0.1, bias_const=1e-6)
            w = jax.nn.initializers.orthogonal(scale=0.1)(
                keys[2 * i], (fan_in, fan_out), jnp.float32)
            b = jnp.full((1, fan_out), 1e-6, dtype=jnp.float32)
        else:
            # PyTorch default nn.Linear init: U(-1/sqrt(fan_in), 1/sqrt(fan_in))
            bound = 1.0 / jnp.sqrt(jnp.float32(fan_in))
            w = jax.random.uniform(keys[2 * i], (fan_in, fan_out),
                                   jnp.float32, -bound, bound)
            b = jax.random.uniform(keys[2 * i + 1], (1, fan_out),
                                   jnp.float32, -bound, bound)
        weights.append(w)
        biases.append(b)

    # ActorBase buffers: state_avg = zeros, state_std = ones
    state_avg = jnp.zeros((1, state_dim), jnp.float32)
    state_std = jnp.ones((1, state_dim), jnp.float32)

    return (state_avg, state_std,
            weights[0], biases[0],
            weights[1], biases[1],
            weights[2], biases[2])


def actor_forward_ref(state, params):
    """Pure-JAX reference for correctness check (un-folded, un-packed math)."""
    avg, std, w0, b0, w1, b1, w2, b2 = params
    x = (state - avg) / std
    h = jnp.maximum(x @ w0 + b0, 0.0)
    h = jnp.maximum(h @ w1 + b1, 0.0)
    return jnp.tanh(h @ w2 + b2)


# TODO(synk): Actor.get_action / get_action_noise (exploration noise via
# torch.randn_like + clamp) are not part of forward(); a Pallas version would
# use pltpu.prng_seed / pltpu.stateful_normal inside the same kernel.

if __name__ == "__main__":
    STATE_DIM = 16
    HIDDEN = (32, 32)
    ACTION_DIM = 4

    key = jax.random.PRNGKey(0)
    k_state1, k_state2, k_params = jax.random.split(key, 3)

    params = init_actor_params(k_params, STATE_DIM, HIDDEN, ACTION_DIM)

    # Pack & fold ONCE (hoisted out of the forward path per the perf review).
    packed_bf16 = pack_actor_params(params, dtype=jnp.bfloat16)   # default fast path
    packed_f32 = pack_actor_params(params, dtype=jnp.float32)     # exactness check

    fwd = jax.jit(functools.partial(actor_forward, action_dim=ACTION_DIM))

    # --- small batch (grid = 1) ---
    B1 = 8
    state1 = jax.random.normal(k_state1, (B1, STATE_DIM), jnp.float32)
    ref1 = actor_forward_ref(state1, params)

    out1 = jax.block_until_ready(fwd(state1, packed_f32))
    assert out1.shape == (B1, ACTION_DIM)
    assert jnp.allclose(out1, ref1, atol=1e-5, rtol=1e-5), "f32 kernel mismatch vs reference"

    out1_bf16 = jax.block_until_ready(fwd(state1, packed_bf16))
    assert out1_bf16.shape == (B1, ACTION_DIM)
    assert jnp.allclose(out1_bf16, ref1, atol=2e-2), "bf16 kernel mismatch vs reference"

    # --- larger batch (exercises batch padding + the >=2-step parallel grid) ---
    B2 = 300
    state2 = jax.random.normal(k_state2, (B2, STATE_DIM), jnp.float32)
    ref2 = actor_forward_ref(state2, params)

    out2 = jax.block_until_ready(fwd(state2, packed_bf16))
    assert out2.shape == (B2, ACTION_DIM)
    assert jnp.allclose(out2, ref2, atol=2e-2), "bf16 kernel (large batch) mismatch vs reference"

    print("KERNEL_OK")
</pallas_src>

<mosaic_0001>
module attributes {stable_mosaic.version = 11 : i64} {
  func.func @actor_kernel(%arg0: i32, %arg1: memref<8x16xf32, #tpu.memory_space<vmem>>, %arg2: memref<392x128xf32, #tpu.memory_space<vmem>>, %arg3: memref<8x4xf32, #tpu.memory_space<vmem>>) attributes {dimension_semantics = [#tpu.dimension_semantics<parallel>], iteration_bounds = array<i64: 1>, scalar_prefetch = 0 : i64, scratch_operands = 0 : i64, tpu.core_type = #tpu.core_type<tc>, window_params = [{transform_indices = @transform_0, window_bounds = array<i64: 8, 16>}, {pipeline_mode = #tpu.pipeline_mode<synchronous>, transform_indices = @transform_1, window_bounds = array<i64: 392, 128>}, {transform_indices = @transform_2, window_bounds = array<i64: 8, 4>}]} {
    %c0 = arith.constant 0 : index
    %c0_0 = arith.constant 0 : index
    %0 = vector.load %arg1[%c0, %c0_0] : memref<8x16xf32, #tpu.memory_space<vmem>>, vector<8x16xf32>
    %c0_1 = arith.constant 0 : index
    %c0_2 = arith.constant 0 : index
    %1 = vector.load %arg2[%c0_1, %c0_2] : memref<392x128xf32, #tpu.memory_space<vmem>>, vector<16x128xf32>
    %c128 = arith.constant 128 : index
    %c0_3 = arith.constant 0 : index
    %2 = vector.load %arg2[%c128, %c0_3] : memref<392x128xf32, #tpu.memory_space<vmem>>, vector<128x128xf32>
    %c256 = arith.constant 256 : index
    %c0_4 = arith.constant 0 : index
    %3 = vector.load %arg2[%c256, %c0_4] : memref<392x128xf32, #tpu.memory_space<vmem>>, vector<128x128xf32>
    %c384 = arith.constant 384 : index
    %c0_5 = arith.constant 0 : index
    %4 = vector.load %arg2[%c384, %c0_5] : memref<392x128xf32, #tpu.memory_space<vmem>>, vector<8x128xf32>
    %cst = arith.constant dense<0.000000e+00> : vector<8x128xf32>
    %5 = tpu.matmul %0, %1, %cst {dimension_numbers = #tpu.dot_dimension_numbers<[1], [0], [0], [1], [0, 0, 1, 1], [], []>} : vector<8x16xf32>, vector<16x128xf32>, vector<8x128xf32> -> vector<8x128xf32>
    %6 = vector.extract_strided_slice %4 {offsets = [0, 0], sizes = [1, 128], strides = [1, 1]} : vector<8x128xf32> to vector<1x128xf32>
    %7 = vector.broadcast %6 : vector<1x128xf32> to vector<8x128xf32>
    %8 = arith.addf %5, %7 : vector<8x128xf32>
    %cst_6 = arith.constant 0.000000e+00 : f32
    %9 = vector.broadcast %cst_6 : f32 to vector<8x128xf32>
    %10 = arith.maximumf %8, %9 : vector<8x128xf32>
    %cst_7 = arith.constant dense<0.000000e+00> : vector<8x128xf32>
    %11 = tpu.matmul %10, %2, %cst_7 {dimension_numbers = #tpu.dot_dimension_numbers<[1], [0], [0], [1], [0, 0, 1, 1], [], []>} : vector<8x128xf32>, vector<128x128xf32>, vector<8x128xf32> -> vector<8x128xf32>
    %12 = vector.extract_strided_slice %4 {offsets = [1, 0], sizes = [1, 128], strides = [1, 1]} : vector<8x128xf32> to vector<1x128xf32>
    %13 = vector.broadcast %12 : vector<1x128xf32> to vector<8x128xf32>
    %14 = arith.addf %11, %13 : vector<8x128xf32>
    %cst_8 = arith.constant 0.000000e+00 : f32
    %15 = vector.broadcast %cst_8 : f32 to vector<8x128xf32>
    %16 = arith.maximumf %14, %15 : vector<8x128xf32>
    %cst_9 = arith.constant dense<0.000000e+00> : vector<8x128xf32>
    %17 = tpu.matmul %16, %3, %cst_9 {dimension_numbers = #tpu.dot_dimension_numbers<[1], [0], [0], [1], [0, 0, 1, 1], [], []>} : vector<8x128xf32>, vector<128x128xf32>, vector<8x128xf32> -> vector<8x128xf32>
    %18 = vector.extract_strided_slice %4 {offsets = [2, 0], sizes = [1, 128], strides = [1, 1]} : vector<8x128xf32> to vector<1x128xf32>
    %19 = vector.broadcast %18 : vector<1x128xf32> to vector<8x128xf32>
    %20 = arith.addf %17, %19 : vector<8x128xf32>
    %21 = vector.extract_strided_slice %20 {offsets = [0, 0], sizes = [8, 4], strides = [1, 1]} : vector<8x128xf32> to vector<8x4xf32>
    %22 = math.tanh %21 : vector<8x4xf32>
    %c0_10 = arith.constant 0 : index
    %c0_11 = arith.constant 0 : index
    %23 = vector.load %arg3[%c0_10, %c0_11] : memref<8x4xf32, #tpu.memory_space<vmem>>, vector<8x4xf32>
    tpu.vector_store %arg3[%c0_10, %c0_11], %22 {strides = array<i32>} : memref<8x4xf32, #tpu.memory_space<vmem>>, vector<8x4xf32>,
    return
  }
  func.func @transform_0(%arg0: i32) -> (i32, i32) {
    %c0_i32 = arith.constant 0 : i32
    %c0_i32_0 = arith.constant 0 : i32
    return %arg0, %c0_i32 : i32, i32
  }
  func.func @transform_1(%arg0: i32) -> (i32, i32) {
    %c0_i32 = arith.constant 0 : i32
    %c0_i32_0 = arith.constant 0 : i32
    %c0_i32_1 = arith.constant 0 : i32
    return %c0_i32, %c0_i32_0 : i32, i32
  }
  func.func @transform_2(%arg0: i32) -> (i32, i32) {
    %c0_i32 = arith.constant 0 : i32
    %c0_i32_0 = arith.constant 0 : i32
    return %arg0, %c0_i32 : i32, i32
  }
}

</mosaic_0001>

<bundles_post_ra>
// kernel: actor_forward.1
= control target key start
LH: loop header
LB: loop body
LE: loop exit
PB: predicated region body
PF: predicated region fallthrough
CT: control target
= control target key end

     0   :  { %7 = vsyncpa [#allocation3], 0  ;;  %s242_s0 = inlined_call_operand.hbm [shape: f32[8,16], index: 0, kind: input, shape index: {}]   ;;  %s243_s1 = inlined_call_operand.hbm [shape: f32[392,128], index: 1, kind: input, shape index: {}]   ;;  %s244_s2 = inlined_call_operand.vmem [shape: f32[8,4], index: 2, kind: output, shape index: {}]  }
   0x1   :  { %s14_s11 = sshll.u32 %s242_s0, 4  ;;  %s15_s11 = int_to_ptr.hbm [resolvable:$true] %s14_s11 }
   0x2   :  { %8 = vsyncpa [#allocation5], 0  ;;  %s214_s12 = smov [#allocation2]   ;;  %s24_s16 = sshll.u32 %s243_s1, 4  ;;  %s25_s16 = int_to_ptr.hbm [resolvable:$true] %s24_s16 }
   0x3   :  { %s16_s13 = sshll.u32 %s214_s12, 4  ;;  %s215_s17 = smov [#allocation4]   ;;  %s17_s13 = int_to_ptr.vmem [resolvable:$true] %s16_s13 }
   0x4   :  { %19 = dma.hbm_to_vmem [thread:$0]  %s15_s11, 128, %s17_s13, [#allocation3]  }
   0x5   :  { %s26_s18 = sshll.u32 %s215_s17, 4  ;;  %s216_s19 = smov 128   ;;  %s27_s18 = int_to_ptr.vmem [resolvable:$true] %s26_s18 }
   0x6   :  { %s217_s20 = smov 8  }
   0x7   :  { %32 = dma.hbm_to_vmem [thread:$0]  %s25_s16, 6272, %s27_s18, [#allocation5], %s216_s19, %s216_s19, %s217_s20  }
   0x8   :  { %210 = dma.done.wait [#allocation3], 128  }
   0x9   :  { %211 = vsyncadd [#allocation3], 4294967168 }
   0xa   :  { %212 = dma.done.wait [#allocation5], 6272  }
   0xb   :  { %213 = vsyncadd [#allocation5], 4294961024  ;;  %v43_v0 = vld [vmem:[#allocation4 + $0x8] sm:$0xff]  ;;  %v42_v1 = vld [vmem:[#allocation4] sm:$0xff]  ;;  %vm78_vm0 = vcmask 130048   ;;  %vm147_vm1 = vcmask 31744  }
   0xc   :  { %96 = vmatpush.msra.mxu0 %v43_v0  ;;  %v41_v2 = vld [vmem:[#allocation2] sm:$0xff]  ;;  %v58_v4 = vld [vmem:[#allocation4 + $0xf0] sm:$0xff]  ;;  %v57_v5 = vld [vmem:[#allocation4 + $0xe8] sm:$0xff] }
   0xd   :  { %v59_v3 = vld [vmem:[#allocation4 + $0xf8] sm:$0xff]  ;;  %v56_v6 = vld [vmem:[#allocation4 + $0xe0] sm:$0xff]  ;;  %v54_v8 = vld [vmem:[#allocation4 + $0xd0] sm:$0xff] }
   0xe   :  { %104 = vmatpush.msra.mxu1 %v59_v3  ;;  %97 = vmatpush.msra.mxu0 %v42_v1  ;;  %v55_v7 = vld [vmem:[#allocation4 + $0xd8] sm:$0xff]  ;;  %v53_v9 = vld [vmem:[#allocation4 + $0xc8] sm:$0xff]  ;;  %v52_v10 = vld [vmem:[#allocation4 + $0xc0] sm:$0xff] }
   0xf   :  { %155 = vmatmul.msk.f32.vlgmr.msra.gmra.mxu0 %vm78_vm0, %v41_v2  ;;  %v51_v11 = vld [vmem:[#allocation4 + $0xb8] sm:$0xff]  ;;  %v50_v12 = vld [vmem:[#allocation4 + $0xb0] sm:$0xff]  ;;  %v49_v13 = vld [vmem:[#allocation4 + $0xa8] sm:$0xff] }
  0x10   :  { %105 = vmatpush.msra.mxu1 %v58_v4  ;;  %v48_v14 = vld [vmem:[#allocation4 + $0xa0] sm:$0xff]  ;;  %v47_v15 = vld [vmem:[#allocation4 + $0x98] sm:$0xff]  ;;  %v46_v16 = vld [vmem:[#allocation4 + $0x90] sm:$0xff] }
  0x11   :  { %v45_v17 = vld [vmem:[#allocation4 + $0x88] sm:$0xff]  ;;  %v44_v18 = vld [vmem:[#allocation4 + $0x80] sm:$0xff]  ;;  %v75_v19 = vld [vmem:[#allocation4 + $0x178] sm:$0xff] }
  0x12   :  { %106 = vmatpush.msra.mxu1 %v57_v5  ;;  %v74_v20 = vld [vmem:[#allocation4 + $0x170] sm:$0xff]  ;;  %126 = vmatpush.msra.mxu2 %v75_v19  ;;  %v73_v21 = vld [vmem:[#allocation4 + $0x168] sm:$0xff]  ;;  %v72_v22 = vld [vmem:[#allocation4 + $0x160] sm:$0xff] }
  0x13   :  { %v71_v23 = vld [vmem:[#allocation4 + $0x158] sm:$0xff]  ;;  %v70_v24 = vld [vmem:[#allocation4 + $0x150] sm:$0xff]  ;;  %v69_v25 = vld [vmem:[#allocation4 + $0x148] sm:$0xff] }
  0x14   :  { %107 = vmatpush.msra.mxu1 %v56_v6  ;;  %127 = vmatpush.msra.mxu2 %v74_v20  ;;  %v68_v26 = vld [vmem:[#allocation4 + $0x140] sm:$0xff]  ;;  %v67_v27 = vld [vmem:[#allocation4 + $0x138] sm:$0xff]  ;;  %v66_v28 = vld [vmem:[#allocation4 + $0x130] sm:$0xff] }
  0x15   :  { %v65_v29 = vld [vmem:[#allocation4 + $0x128] sm:$0xff]  ;;  %v64_v30 = vld [vmem:[#allocation4 + $0x120] sm:$0xff]  ;;  %v63_v32 = vld [vmem:[#allocation4 + $0x118] sm:$0xff] }
  0x16   :  { %108 = vmatpush.msra.mxu1 %v55_v7  ;;  %128 = vmatpush.msra.mxu2 %v73_v21  ;;  %v76_v31 = vld [vmem:[#allocation4 + $0x180] sm:$0xff]  ;;  %v62_v37 = vld [vmem:[#allocation4 + $0x110] sm:$0xff]  ;;  %v61_v38 = vld [vmem:[#allocation4 + $0x108] sm:$0xff] }
  0x17   :  { %v77_v33 = vperm.slane %v76_v31, 0  ;;  %v60_v39 = vld [vmem:[#allocation4 + $0x100] sm:$0xff]  ;;  %v103_v40 = vperm.slane %v76_v31, 1  ;;  %v125_v44 = vperm.slane %v76_v31, 2 }
  0x18   :  { %109 = vmatpush.msra.mxu1 %v54_v8  ;;  %129 = vmatpush.msra.mxu2 %v72_v22 }
  0x1a   :  { %110 = vmatpush.msra.mxu1 %v53_v9  ;;  %130 = vmatpush.msra.mxu2 %v71_v23 }
  0x1c   :  { %111 = vmatpush.msra.mxu1 %v52_v10  ;;  %131 = vmatpush.msra.mxu2 %v70_v24 }
  0x1e   :  { %112 = vmatpush.msra.mxu1 %v51_v11  ;;  %132 = vmatpush.msra.mxu2 %v69_v25 }
  0x20   :  { %113 = vmatpush.msra.mxu1 %v50_v12  ;;  %133 = vmatpush.msra.mxu2 %v68_v26 }
  0x22   :  { %114 = vmatpush.msra.mxu1 %v49_v13  ;;  %134 = vmatpush.msra.mxu2 %v67_v27 }
  0x24   :  { %115 = vmatpush.msra.mxu1 %v48_v14  ;;  %135 = vmatpush.msra.mxu2 %v66_v28 }
  0x26   :  { %116 = vmatpush.msra.mxu1 %v47_v15  ;;  %136 = vmatpush.msra.mxu2 %v65_v29 }
  0x28   :  { %117 = vmatpush.msra.mxu1 %v46_v16  ;;  %137 = vmatpush.msra.mxu2 %v64_v30 }
  0x2a   :  { %118 = vmatpush.msra.mxu1 %v45_v17  ;;  %138 = vmatpush.msra.mxu2 %v63_v32 }
  0x2c   :  { %119 = vmatpush.msra.mxu1 %v44_v18  ;;  %139 = vmatpush.msra.mxu2 %v62_v37 }
  0x2e   :  { %140 = vmatpush.msra.mxu2 %v61_v38 }
  0x30   :  { %141 = vmatpush.msra.mxu2 %v60_v39 }
  0x8c   :  { %v99_v34 = vpop.f32.mrf.mxu0 }
  0x8d   :  { %v100_v35 = vadd.f32 %v99_v34, %v77_v33 }
  0x8f   :  { %v102_v36 = vmax.f32 %v100_v35, 0.0 }
  0x91   :  { %120 = vmatmul.f32.vlgmr.msra.gmra.mxu1 %v102_v36 }
 0x10e   :  { %v121_v41 = vpop.f32.mrf.mxu1 }
 0x10f   :  { %v122_v42 = vadd.f32 %v121_v41, %v103_v40 }
 0x111   :  { %v124_v43 = vmax.f32 %v122_v42, 0.0 }
 0x113   :  { %142 = vmatmul.f32.vlgmr.msra.gmra.mxu2 %v124_v43 }
 0x196   :  { %v143_v45 = vpop.f32.mrf.mxu2 }
 0x197   :  { %v144_v46 = vadd.f32 %v143_v45, %v125_v44 }
 0x199   :  { %160 = vtanh.f32 %v144_v46 }
 0x19f   :  { %v161_v47 = vpop.eup %160 }
 0x1a0   :  { %148 = vst.msk [vmem:[%s244_s2] sm:$0xff] %vm147_vm1, %v161_v47 }
 0x1a1   :  { %153 = vsyncpa [#allocation3], 1 }
 0x1a2   :  { %154 = vsyncpa [#allocation5], 1 }

</bundles_post_ra>
